<compile_context>
chip_gen: v7x
topology: tpu7x:2x2x1
jax: 0.10.0
libtpu: 0.0.40
codegen_flags: <defaults>
</compile_context>

<pallas_src>
import functools

import jax
import jax.numpy as jnp
from jax import lax
from jax.experimental import pallas as pl
from jax.experimental.pallas import tpu as pltpu

LANE = 128


def _round_up(v, m):
    return ((v + m - 1) // m) * m


def _pick_tile(n_pad, candidates):
    for t in candidates:
        if t <= n_pad and n_pad % t == 0:
            return t
    return LANE


def _tpu_vmem_capacity_bytes(default=64 * 1024 * 1024):
    try:
        cap = getattr(pltpu.get_tpu_info(), "vmem_capacity_bytes", None)
        if cap:
            return int(cap)
    except Exception:
        pass
    return default


def _pad2d(a, rows, cols):
    out = jnp.zeros((rows, cols), jnp.float32)
    return out.at[: a.shape[0], : a.shape[1]].set(a.astype(jnp.float32))


# --------------------------- kernel 1: conv1 + relu + layer-2 projections ---------------------

def _sage_layer1_kernel(a_ref, xn_ref, xr_ref, invdeg_ref,
                        w1_ref, b1_ref, wl2_ref, wr2_ref, b2_ref,
                        p_ref, r_ref, acc_ref):
    k = pl.program_id(1)

    @pl.when(k == 0)
    def _():
        acc_ref[...] = jnp.zeros_like(acc_ref)

    # Neighbour sum on the MXU: bf16 0/1 adjacency tile x bf16 feature tile, f32 accumulate.
    acc_ref[...] += jnp.dot(a_ref[...], xn_ref[...], preferred_element_type=jnp.float32)

    @pl.when(k == pl.num_programs(1) - 1)
    def _():
        agg = acc_ref[...] * invdeg_ref[...]                    # mean = sum * 1/deg (f32, VPU)
        feat = jnp.concatenate([agg, xr_ref[...]], axis=1)      # [tm, 2*Fp], lane-aligned concat
        h1 = jnp.dot(feat, w1_ref[...], preferred_element_type=jnp.float32) + b1_ref[...]
        h1 = jnp.maximum(h1, 0.0)                               # relu
        # TODO(synk): F.dropout(training=True) is stochastic; eval-mode identity implemented.
        # Reassociated layer 2: project through Wl2 / Wr2 here so the O(N^2) matmul in
        # kernel 2 runs at width C_pad instead of H_pad.
        p_ref[...] = jnp.dot(h1, wl2_ref[...],
                             preferred_element_type=jnp.float32).astype(p_ref.dtype)
        r_ref[...] = jnp.dot(h1, wr2_ref[...],
                             preferred_element_type=jnp.float32) + b2_ref[...]


# --------------------------- kernel 2: conv2 aggregation + masked log_softmax -----------------

def _sage_layer2_kernel(a_ref, p_ref, r_ref, invdeg_ref, out_ref, acc_ref, *, num_classes):
    k = pl.program_id(1)

    @pl.when(k == 0)
    def _():
        acc_ref[...] = jnp.zeros_like(acc_ref)

    acc_ref[...] += jnp.dot(a_ref[...], p_ref[...], preferred_element_type=jnp.float32)

    @pl.when(k == pl.num_programs(1) - 1)
    def _():
        h2 = acc_ref[...] * invdeg_ref[...] + r_ref[...]
        # Mask padded class lanes so they do not perturb the log_softmax.
        col = lax.broadcasted_iota(jnp.int32, h2.shape, 1)
        h2 = jnp.where(col < num_classes, h2, -1e30)
        m = jnp.max(h2, axis=1, keepdims=True)
        z = h2 - m
        lse = jnp.log(jnp.sum(jnp.exp(z), axis=1, keepdims=True))
        out_ref[...] = z - lse


# --------------------------- wrapper -----------------------------------------------------------

def sage_net_forward(x, edge_index, params):
    """x: [N, Fin] float32, edge_index: [2, E] int32 (row0=src, row1=dst)."""
    n, fin = x.shape
    hid = params["wl1"].shape[1]
    c = params["wl2"].shape[1]

    n_pad = _round_up(n, LANE)
    fin_pad = _round_up(fin, LANE)
    h_pad = _round_up(hid, LANE)
    c_pad = _round_up(c, LANE)

    # ---- glue (plain JAX): dense 0/1 adjacency + degrees ----------------------------------
    # TODO(synk): for large sparse graphs replace this O(N^2) dense build with CSR row-ptr /
    # col-idx via PrefetchScalarGridSpec and an in-kernel gather of neighbour rows.
    src = edge_index[0].astype(jnp.int32)
    dst = edge_index[1].astype(jnp.int32)
    adj = jnp.zeros((n_pad, n_pad), jnp.float32).at[dst, src].add(1.0)
    deg = jnp.sum(adj, axis=1, keepdims=True)
    inv_deg = 1.0 / jnp.maximum(deg, 1.0)                # [n_pad, 1] f32
    a01 = adj.astype(jnp.bfloat16)                       # small-int counts exact in bf16

    x_f32 = _pad2d(x, n_pad, fin_pad)                    # root branch operand (f32)
    x_bf16 = x_f32.astype(jnp.bfloat16)                  # neighbour branch MXU operand (bf16)

    # Layer-1 projections fused: [agg, x] @ [Wl1; Wr1].
    w1 = jnp.concatenate([_pad2d(params["wl1"], fin_pad, h_pad),
                          _pad2d(params["wr1"], fin_pad, h_pad)], axis=0)
    b1 = _pad2d(params["b1"], 1, h_pad)
    wl2 = _pad2d(params["wl2"], h_pad, c_pad)
    wr2 = _pad2d(params["wr2"], h_pad, c_pad)
    b2 = _pad2d(params["b2"], 1, c_pad)

    # ---- tiling / compiler params -----------------------------------------------------------
    vmem_cap = _tpu_vmem_capacity_bytes()
    vmem_limit = int(min(vmem_cap * 3 // 4, 112 * 1024 * 1024))   # ~96 MiB v5e/v6e, ~48 MiB v7x
    tm = _pick_tile(n_pad, (256, 128))
    tk_cands = (1024, 512, 256, 128) if vmem_cap > (64 << 20) else (512, 256, 128)
    tk = _pick_tile(n_pad, tk_cands)
    grid = (n_pad // tm, n_pad // tk)

    cparams = pltpu.CompilerParams(
        dimension_semantics=("parallel", "arbitrary"),
        vmem_limit_bytes=vmem_limit)

    full = lambda r, cc: pl.BlockSpec((r, cc), lambda i, k: (0, 0))
    row = lambda cc: pl.BlockSpec((tm, cc), lambda i, k: (i, 0))
    colblk = lambda cc: pl.BlockSpec((tk, cc), lambda i, k: (k, 0))

    # ---- kernel 1: conv1 (+relu) and the two layer-2 projections ----------------------------
    p_bf16, r_f32 = pl.pallas_call(
        _sage_layer1_kernel,
        out_shape=(jax.ShapeDtypeStruct((n_pad, c_pad), jnp.bfloat16),
                   jax.ShapeDtypeStruct((n_pad, c_pad), jnp.float32)),
        grid_spec=pltpu.PrefetchScalarGridSpec(
            num_scalar_prefetch=0,
            grid=grid,
            in_specs=[
                pl.BlockSpec((tm, tk), lambda i, k: (i, k)),   # A (bf16, 0/1)
                colblk(fin_pad),                               # X neighbour block (bf16)
                row(fin_pad),                                  # X root block (f32)
                row(1),                                        # 1/deg
                full(2 * fin_pad, h_pad),                      # [Wl1; Wr1]
                full(1, h_pad),                                # b1
                full(h_pad, c_pad),                            # Wl2
                full(h_pad, c_pad),                            # Wr2
                full(1, c_pad),                                # b2
            ],
            out_specs=[row(c_pad), row(c_pad)],
            scratch_shapes=[pltpu.VMEM((tm, fin_pad), jnp.float32)]),
        compiler_params=cparams,
    )(a01, x_bf16, x_f32, inv_deg, w1, b1, wl2, wr2, b2)

    # ---- kernel 2: conv2 aggregation + root/bias add + masked log_softmax -------------------
    out_pad = pl.pallas_call(
        functools.partial(_sage_layer2_kernel, num_classes=c),
        out_shape=jax.ShapeDtypeStruct((n_pad, c_pad), jnp.float32),
        grid_spec=pltpu.PrefetchScalarGridSpec(
            num_scalar_prefetch=0,
            grid=grid,
            in_specs=[
                pl.BlockSpec((tm, tk), lambda i, k: (i, k)),   # A (bf16, 0/1)
                colblk(c_pad),                                 # P = h1 @ Wl2 (bf16)
                row(c_pad),                                    # r = h1 @ Wr2 + b2 (f32)
                row(1),                                        # 1/deg
            ],
            out_specs=row(c_pad),
            scratch_shapes=[pltpu.VMEM((tm, c_pad), jnp.float32)]),
        compiler_params=cparams,
    )(a01, p_bf16, r_f32, inv_deg)

    return out_pad[:n, :c]


# --------------------------- params + pure-JAX reference ---------------------------------------

def init_params(key, input_size, hid_size, class_size):
    ks = jax.random.split(key, 4)

    def glorot(k, shape):
        fan_in, fan_out = shape
        lim = (6.0 / (fan_in + fan_out)) ** 0.5
        return jax.random.uniform(k, shape, jnp.float32, -lim, lim)

    return {
        # conv1: lin_l (neighbour branch, has bias), lin_r (root branch, no bias)
        "wl1": glorot(ks[0], (input_size, hid_size)),
        "wr1": glorot(ks[1], (input_size, hid_size)),
        "b1": jnp.zeros((1, hid_size), jnp.float32),
        # conv2
        "wl2": glorot(ks[2], (hid_size, class_size)),
        "wr2": glorot(ks[3], (hid_size, class_size)),
        "b2": jnp.zeros((1, class_size), jnp.float32),
    }


def _reference_forward(x, edge_index, params):
    n = x.shape[0]
    src, dst = edge_index[0], edge_index[1]
    adj = jnp.zeros((n, n), jnp.float32).at[dst, src].add(1.0)
    deg = jnp.maximum(jnp.sum(adj, axis=1, keepdims=True), 1.0)
    a_norm = adj / deg
    h1 = jnp.maximum(a_norm @ x @ params["wl1"] + params["b1"] + x @ params["wr1"], 0.0)
    h2 = a_norm @ h1 @ params["wl2"] + params["b2"] + h1 @ params["wr2"]
    return jax.nn.log_softmax(h2, axis=1)


if __name__ == "__main__":
    N, INPUT_SIZE, HID_SIZE, CLASS_SIZE, E = 32, 16, 32, 8, 64

    key = jax.random.PRNGKey(0)
    kx, ke, kp = jax.random.split(key, 3)

    x = jax.random.normal(kx, (N, INPUT_SIZE), jnp.float32)
    edge_index = jax.random.randint(ke, (2, E), 0, N, jnp.int32)
    params = init_params(kp, INPUT_SIZE, HID_SIZE, CLASS_SIZE)

    out = sage_net_forward(x, edge_index, params)
    out = jax.block_until_ready(out)

    assert out.shape == (N, CLASS_SIZE)
    # log_softmax rows must (numerically) sum to 1 in prob space
    assert bool(jnp.all(jnp.abs(jnp.sum(jnp.exp(out), axis=1) - 1.0) < 1e-4))
    # loose agreement with a pure-JAX f32 reference (bf16 adjacency/P path introduces ~1e-2 noise)
    ref = _reference_forward(x, edge_index, params)
    assert bool(jnp.max(jnp.abs(out - ref)) < 0.1)
    print("KERNEL_OK")
</pallas_src>

<mosaic_0001>
module attributes {stable_mosaic.version = 11 : i64} {
  func.func @_sage_layer1_kernel(%arg0: i32, %arg1: i32, %arg2: memref<128x128xbf16, #tpu.memory_space<vmem>>, %arg3: memref<128x128xbf16, #tpu.memory_space<vmem>>, %arg4: memref<128x128xf32, #tpu.memory_space<vmem>>, %arg5: memref<128x1xf32, #tpu.memory_space<vmem>>, %arg6: memref<256x128xf32, #tpu.memory_space<vmem>>, %arg7: memref<1x128xf32, #tpu.memory_space<vmem>>, %arg8: memref<128x128xf32, #tpu.memory_space<vmem>>, %arg9: memref<128x128xf32, #tpu.memory_space<vmem>>, %arg10: memref<1x128xf32, #tpu.memory_space<vmem>>, %arg11: memref<128x128xbf16, #tpu.memory_space<vmem>>, %arg12: memref<128x128xf32, #tpu.memory_space<vmem>>, %arg13: memref<128x128xf32, #tpu.memory_space<vmem>>) attributes {dimension_semantics = [#tpu.dimension_semantics<parallel>, #tpu.dimension_semantics<arbitrary>], iteration_bounds = array<i64: 1, 1>, scalar_prefetch = 0 : i64, scratch_operands = 1 : i64, tpu.core_type = #tpu.core_type<tc>, window_params = [{transform_indices = @transform_0, window_bounds = array<i64: 128, 128>}, {transform_indices = @transform_1, window_bounds = array<i64: 128, 128>}, {transform_indices = @transform_2, window_bounds = array<i64: 128, 128>}, {transform_indices = @transform_3, window_bounds = array<i64: 128, 1>}, {pipeline_mode = #tpu.pipeline_mode<synchronous>, transform_indices = @transform_4, window_bounds = array<i64: 256, 128>}, {pipeline_mode = #tpu.pipeline_mode<synchronous>, transform_indices = @transform_5, window_bounds = array<i64: 1, 128>}, {pipeline_mode = #tpu.pipeline_mode<synchronous>, transform_indices = @transform_6, window_bounds = array<i64: 128, 128>}, {pipeline_mode = #tpu.pipeline_mode<synchronous>, transform_indices = @transform_7, window_bounds = array<i64: 128, 128>}, {pipeline_mode = #tpu.pipeline_mode<synchronous>, transform_indices = @transform_8, window_bounds = array<i64: 1, 128>}, {transform_indices = @transform_9, window_bounds = array<i64: 128, 128>}, {transform_indices = @transform_10, window_bounds = array<i64: 128, 128>}]} {
    %c0_i32 = arith.constant 0 : i32
    %0 = arith.cmpi eq, %arg1, %c0_i32 : i32
    %1 = arith.extui %0 : i1 to i32
    %c0_i32_0 = arith.constant 0 : i32
    %2 = arith.cmpi ne, %1, %c0_i32_0 : i32
    scf.if %2 {
      %cst_10 = arith.constant 0.000000e+00 : f32
      %12 = vector.broadcast %cst_10 : f32 to vector<128x128xf32>
      %c0_11 = arith.constant 0 : index
      %c0_12 = arith.constant 0 : index
      %13 = vector.load %arg13[%c0_11, %c0_12] : memref<128x128xf32, #tpu.memory_space<vmem>>, vector<128x128xf32>
      tpu.vector_store %arg13[%c0_11, %c0_12], %12 {strides = array<i32>} : memref<128x128xf32, #tpu.memory_space<vmem>>, vector<128x128xf32>,
    } else {
    }
    %c0 = arith.constant 0 : index
    %c0_1 = arith.constant 0 : index
    %3 = vector.load %arg13[%c0, %c0_1] : memref<128x128xf32, #tpu.memory_space<vmem>>, vector<128x128xf32>
    %c0_2 = arith.constant 0 : index
    %c0_3 = arith.constant 0 : index
    %4 = vector.load %arg2[%c0_2, %c0_3] : memref<128x128xbf16, #tpu.memory_space<vmem>>, vector<128x128xbf16>
    %c0_4 = arith.constant 0 : index
    %c0_5 = arith.constant 0 : index
    %5 = vector.load %arg3[%c0_4, %c0_5] : memref<128x128xbf16, #tpu.memory_space<vmem>>, vector<128x128xbf16>
    %cst = arith.constant dense<0.000000e+00> : vector<128x128xf32>
    %6 = tpu.matmul %4, %5, %cst {dimension_numbers = #tpu.dot_dimension_numbers<[1], [0], [0], [1], [0, 0, 1, 1], [], []>} : vector<128x128xbf16>, vector<128x128xbf16>, vector<128x128xf32> -> vector<128x128xf32>
    %7 = arith.addf %3, %6 : vector<128x128xf32>
    %c0_6 = arith.constant 0 : index
    %c0_7 = arith.constant 0 : index
    %8 = vector.load %arg13[%c0_6, %c0_7] : memref<128x128xf32, #tpu.memory_space<vmem>>, vector<128x128xf32>
    tpu.vector_store %arg13[%c0_6, %c0_7], %7 {strides = array<i32>} : memref<128x128xf32, #tpu.memory_space<vmem>>, vector<128x128xf32>,
    %c0_i32_8 = arith.constant 0 : i32
    %9 = arith.cmpi eq, %arg1, %c0_i32_8 : i32
    %10 = arith.extui %9 : i1 to i32
    %c0_i32_9 = arith.constant 0 : i32
    %11 = arith.cmpi ne, %10, %c0_i32_9 : i32
    scf.if %11 {
      %c0_10 = arith.constant 0 : index
      %c0_11 = arith.constant 0 : index
      %12 = vector.load %arg13[%c0_10, %c0_11] : memref<128x128xf32, #tpu.memory_space<vmem>>, vector<128x128xf32>
      %c0_12 = arith.constant 0 : index
      %c0_13 = arith.constant 0 : index
      %13 = vector.load %arg5[%c0_12, %c0_13] : memref<128x1xf32, #tpu.memory_space<vmem>>, vector<128x1xf32>
      %14 = vector.broadcast %13 : vector<128x1xf32> to vector<128x128xf32>
      %15 = arith.mulf %12, %14 : vector<128x128xf32>
      %c0_14 = arith.constant 0 : index
      %c0_15 = arith.constant 0 : index
      %16 = vector.load %arg4[%c0_14, %c0_15] : memref<128x128xf32, #tpu.memory_space<vmem>>, vector<128x128xf32>
      %17 = tpu.concatenate %15, %16 in 1 : vector<128x128xf32>, vector<128x128xf32> -> vector<128x256xf32>
      %c0_16 = arith.constant 0 : index
      %c0_17 = arith.constant 0 : index
      %18 = vector.load %arg6[%c0_16, %c0_17] : memref<256x128xf32, #tpu.memory_space<vmem>>, vector<256x128xf32>
      %cst_18 = arith.constant dense<0.000000e+00> : vector<128x128xf32>
      %19 = tpu.matmul %17, %18, %cst_18 {dimension_numbers = #tpu.dot_dimension_numbers<[1], [0], [0], [1], [0, 0, 1, 1], [], []>} : vector<128x256xf32>, vector<256x128xf32>, vector<128x128xf32> -> vector<128x128xf32>
      %c0_19 = arith.constant 0 : index
      %c0_20 = arith.constant 0 : index
      %20 = vector.load %arg7[%c0_19, %c0_20] : memref<1x128xf32, #tpu.memory_space<vmem>>, vector<1x128xf32>
      %21 = vector.broadcast %20 : vector<1x128xf32> to vector<128x128xf32>
      %22 = arith.addf %19, %21 : vector<128x128xf32>
      %cst_21 = arith.constant 0.000000e+00 : f32
      %23 = vector.broadcast %cst_21 : f32 to vector<128x128xf32>
      %24 = arith.maximumf %22, %23 : vector<128x128xf32>
      %c0_22 = arith.constant 0 : index
      %c0_23 = arith.constant 0 : index
      %25 = vector.load %arg8[%c0_22, %c0_23] : memref<128x128xf32, #tpu.memory_space<vmem>>, vector<128x128xf32>
      %cst_24 = arith.constant dense<0.000000e+00> : vector<128x128xf32>
      %26 = tpu.matmul %24, %25, %cst_24 {dimension_numbers = #tpu.dot_dimension_numbers<[1], [0], [0], [1], [0, 0, 1, 1], [], []>} : vector<128x128xf32>, vector<128x128xf32>, vector<128x128xf32> -> vector<128x128xf32>
      %27 = arith.truncf %26 : vector<128x128xf32> to vector<128x128xbf16>
      %c0_25 = arith.constant 0 : index
      %c0_26 = arith.constant 0 : index
      %28 = vector.load %arg11[%c0_25, %c0_26] : memref<128x128xbf16, #tpu.memory_space<vmem>>, vector<128x128xbf16>
      tpu.vector_store %arg11[%c0_25, %c0_26], %27 {strides = array<i32>} : memref<128x128xbf16, #tpu.memory_space<vmem>>, vector<128x128xbf16>,
      %c0_27 = arith.constant 0 : index
      %c0_28 = arith.constant 0 : index
      %29 = vector.load %arg9[%c0_27, %c0_28] : memref<128x128xf32, #tpu.memory_space<vmem>>, vector<128x128xf32>
      %cst_29 = arith.constant dense<0.000000e+00> : vector<128x128xf32>
      %30 = tpu.matmul %24, %29, %cst_29 {dimension_numbers = #tpu.dot_dimension_numbers<[1], [0], [0], [1], [0, 0, 1, 1], [], []>} : vector<128x128xf32>, vector<128x128xf32>, vector<128x128xf32> -> vector<128x128xf32>
      %c0_30 = arith.constant 0 : index
      %c0_31 = arith.constant 0 : index
      %31 = vector.load %arg10[%c0_30, %c0_31] : memref<1x128xf32, #tpu.memory_space<vmem>>, vector<1x128xf32>
      %32 = vector.broadcast %31 : vector<1x128xf32> to vector<128x128xf32>
      %33 = arith.addf %30, %32 : vector<128x128xf32>
      %c0_32 = arith.constant 0 : index
      %c0_33 = arith.constant 0 : index
      %34 = vector.load %arg12[%c0_32, %c0_33] : memref<128x128xf32, #tpu.memory_space<vmem>>, vector<128x128xf32>
      tpu.vector_store %arg12[%c0_32, %c0_33], %33 {strides = array<i32>} : memref<128x128xf32, #tpu.memory_space<vmem>>, vector<128x128xf32>,
    } else {
    }
    return
  }
  func.func @transform_0(%arg0: i32, %arg1: i32) -> (i32, i32) {
    %c0_i32 = arith.constant 0 : i32
    return %arg0, %arg1 : i32, i32
  }
  func.func @transform_1(%arg0: i32, %arg1: i32) -> (i32, i32) {
    %c0_i32 = arith.constant 0 : i32
    %c0_i32_0 = arith.constant 0 : i32
    return %arg1, %c0_i32 : i32, i32
  }
  func.func @transform_2(%arg0: i32, %arg1: i32) -> (i32, i32) {
    %c0_i32 = arith.constant 0 : i32
    %c0_i32_0 = arith.constant 0 : i32
    return %arg0, %c0_i32 : i32, i32
  }
  func.func @transform_3(%arg0: i32, %arg1: i32) -> (i32, i32) {
    %c0_i32 = arith.constant 0 : i32
    %c0_i32_0 = arith.constant 0 : i32
    return %arg0, %c0_i32 : i32, i32
  }
  func.func @transform_4(%arg0: i32, %arg1: i32) -> (i32, i32) {
    %c0_i32 = arith.constant 0 : i32
    %c0_i32_0 = arith.constant 0 : i32
    %c0_i32_1 = arith.constant 0 : i32
    return %c0_i32, %c0_i32_0 : i32, i32
  }
  func.func @transform_5(%arg0: i32, %arg1: i32) -> (i32, i32) {
    %c0_i32 = arith.constant 0 : i32
    %c0_i32_0 = arith.constant 0 : i32
    %c0_i32_1 = arith.constant 0 : i32
    return %c0_i32, %c0_i32_0 : i32, i32
  }
  func.func @transform_6(%arg0: i32, %arg1: i32) -> (i32, i32) {
    %c0_i32 = arith.constant 0 : i32
    %c0_i32_0 = arith.constant 0 : i32
    %c0_i32_1 = arith.constant 0 : i32
    return %c0_i32, %c0_i32_0 : i32, i32
  }
  func.func @transform_7(%arg0: i32, %arg1: i32) -> (i32, i32) {
    %c0_i32 = arith.constant 0 : i32
    %c0_i32_0 = arith.constant 0 : i32
    %c0_i32_1 = arith.constant 0 : i32
    return %c0_i32, %c0_i32_0 : i32, i32
  }
  func.func @transform_8(%arg0: i32, %arg1: i32) -> (i32, i32) {
    %c0_i32 = arith.constant 0 : i32
    %c0_i32_0 = arith.constant 0 : i32
    %c0_i32_1 = arith.constant 0 : i32
    return %c0_i32, %c0_i32_0 : i32, i32
  }
  func.func @transform_9(%arg0: i32, %arg1: i32) -> (i32, i32) {
    %c0_i32 = arith.constant 0 : i32
    %c0_i32_0 = arith.constant 0 : i32
    return %arg0, %c0_i32 : i32, i32
  }
  func.func @transform_10(%arg0: i32, %arg1: i32) -> (i32, i32) {
    %c0_i32 = arith.constant 0 : i32
    %c0_i32_0 = arith.constant 0 : i32
    return %arg0, %c0_i32 : i32, i32
  }
}

</mosaic_0001>

<bundles_post_ra>
// kernel: tpu_custom_call.1
= control target key start
LH: loop header
LB: loop body
LE: loop exit
PB: predicated region body
PF: predicated region fallthrough
CT: control target
= control target key end

     0   :  { %16 = vsyncpa [#allocation4], 0  ;;  %s2308_s0 = inlined_call_operand.hbm [shape: bf16[128,128], index: 0, kind: input, shape index: {}]   ;;  %s2309_s1 = inlined_call_operand.hbm [shape: bf16[128,128], index: 1, kind: input, shape index: {}]   ;;  %s2310_s2 = inlined_call_operand.vmem [shape: f32[128,128], index: 2, kind: input, shape index: {}]   ;;  %s2311_s3 = inlined_call_operand.vmem [shape: f32[128,1], index: 3, kind: input, shape index: {}]   ;;  %s2312_s4 = inlined_call_operand.hbm [shape: f32[256,128], index: 4, kind: input, shape index: {}]   ;;  %s2313_s5 = inlined_call_operand.vmem [shape: f32[1,128], index: 5, kind: input, shape index: {}]   ;;  %s2314_s6 = inlined_call_operand.hbm [shape: f32[128,128], index: 6, kind: input, shape index: {}]   ;;  %s2315_s7 = inlined_call_operand.hbm [shape: f32[128,128], index: 7, kind: input, shape index: {}]   ;;  %s2316_s8 = inlined_call_operand.vmem [shape: f32[1,128], index: 8, kind: input, shape index: {}]   ;;  %s2317_s9 = inlined_call_operand.hbm [shape: bf16[128,128], index: 9, kind: output, shape index: {0}]   ;;  %s2318_s10 = inlined_call_operand.hbm [shape: f32[128,128], index: 10, kind: output, shape index: {1}]  }
   0x1   :  { %17 = vsyncpa [#allocation7], 0 }
   0x2   :  { %18 = vsyncpa [#allocation10], 0 }
   0x3   :  { %19 = vsyncpa [#allocation5], 0 }
   0x4   :  { %20 = vsyncpa [#allocation14], 0  ;;  %s1912_s13 = smov [#allocation6]   ;;  %s1748_s17 = scalar_lea.hbm %s2309_s1, 1024 }
   0x5   :  { %s38_s14 = sshll.u32 %s1912_s13, 4  ;;  %p1749_p0 = scmp.ne.s32.totalorder %s2309_s1, %s1748_s17  ;;  %s39_s14 = int_to_ptr.vmem [resolvable:$true] %s38_s14 }
   0x6   :  { %p1752_p1 = scmp.lt.u32.totalorder %s1748_s17, %s2309_s1 }
   0x8   :  { %p1754_p2 = pnand %p1752_p1, %p1749_p0 }
   0xa   :  { %1757 = shalt.err (!%p1754_p2)
}
   0xb   :  { %s1758_s22 = scalar_lea.vmem %s39_s14, 1024  ;;  %p1763_p4 = scmp.lt.s32.totalorder %s39_s14, %s39_s14 }
   0xc   :  { %p1759_p3 = scmp.ne.s32.totalorder %s39_s14, %s1758_s22  ;;  %p1764_p5 = scmp.lt.s32.totalorder %s1758_s22, %s1758_s22 }
   0xe   :  { %p1765_p6 = por %p1764_p5, %p1763_p4 }
  0x10   :  { %p1766_p7 = pnand %p1765_p6, %p1759_p3 }
  0x12   :  { %1769 = shalt.err (!%p1766_p7)
}
  0x13   :  { %s1913_s23 = smov 64   ;;  %s1914_s24 = smov 4  }
  0x14   :  { %44 = dma.hbm_to_vmem [thread:$0]  %s2309_s1, 1024, %s39_s14, [#allocation7], %s1913_s23, %s1913_s23, %s1914_s24  }
  0x15   :  { %s1915_s27 = smov [#allocation9]   ;;  %s1916_s29 = smov [#allocation3]  }
  0x16   :  { %s68_s28 = sshll.u32 %s1915_s27, 4  ;;  %s26_s30 = sshll.u32 %s1916_s29, 4  ;;  %s69_s28 = int_to_ptr.vmem [resolvable:$true] %s68_s28  ;;  %s27_s30 = int_to_ptr.vmem [resolvable:$true] %s26_s30 }
  0x17   :  { %s1770_s13 = scalar_lea.hbm %s2314_s6, 2048 }
  0x18   :  { %p1771_p8 = scmp.ne.s32.totalorder %s2314_s6, %s1770_s13  ;;  %p1774_p9 = scmp.lt.u32.totalorder %s1770_s13, %s2314_s6 }
  0x1a   :  { %p1776_p10 = pnand %p1774_p9, %p1771_p8 }
  0x1c   :  { %1779 = shalt.err (!%p1776_p10)
}
  0x1d   :  { %s1780_s1 = scalar_lea.vmem %s69_s28, 2048  ;;  %p1785_p12 = scmp.lt.s32.totalorder %s69_s28, %s69_s28 }
  0x1e   :  { %p1781_p11 = scmp.ne.s32.totalorder %s69_s28, %s1780_s1  ;;  %p1786_p13 = scmp.lt.s32.totalorder %s1780_s1, %s1780_s1 }
  0x20   :  { %p1787_p0 = por %p1786_p13, %p1785_p12 }
  0x22   :  { %p1788_p1 = pnand %p1787_p0, %p1781_p11 }
  0x24   :  { %1791 = shalt.err (!%p1788_p1)
}
  0x25   :  { %s1917_s14 = smov 128   ;;  %s1918_s19 = smov 8  }
  0x26   :  { %74 = dma.hbm_to_vmem [thread:$0]  %s2314_s6, 2048, %s69_s28, [#allocation10], %s1917_s14, %s1917_s14, %s1918_s19  }
  0x27   :  { %s1792_s26 = scalar_lea.hbm %s2308_s0, 1024 }
  0x28   :  { %p1793_p2 = scmp.ne.s32.totalorder %s2308_s0, %s1792_s26  ;;  %p1796_p3 = scmp.lt.u32.totalorder %s1792_s26, %s2308_s0 }
  0x2a   :  { %p1798_p4 = pnand %p1796_p3, %p1793_p2 }
  0x2c   :  { %1801 = shalt.err (!%p1798_p4)
}
  0x2d   :  { %s1802_s13 = scalar_lea.vmem %s27_s30, 1024  ;;  %p1807_p6 = scmp.lt.s32.totalorder %s27_s30, %s27_s30 }
  0x2e   :  { %p1803_p5 = scmp.ne.s32.totalorder %s27_s30, %s1802_s13  ;;  %p1808_p7 = scmp.lt.s32.totalorder %s1802_s13, %s1802_s13 }
  0x30   :  { %p1809_p8 = por %p1808_p7, %p1807_p6 }
  0x32   :  { %p1810_p9 = pnand %p1809_p8, %p1803_p5 }
  0x34   :  { %1813 = shalt.err (!%p1810_p9)
}
  0x35   :  { %32 = dma.hbm_to_vmem [thread:$0]  %s2308_s0, 1024, %s27_s30, [#allocation4], %s1913_s23, %s1913_s23, %s1914_s24  }
  0x36   :  { %s1919_s15 = smov [#allocation8]   ;;  %s1920_s17 = smov [#allocation11]  }
  0x37   :  { %s54_s16 = sshll.u32 %s1919_s15, 4  ;;  %s80_s18 = sshll.u32 %s1920_s17, 4  ;;  %s55_s16 = int_to_ptr.vmem [resolvable:$true] %s54_s16  ;;  %s81_s18 = int_to_ptr.vmem [resolvable:$true] %s80_s18 }
  0x38   :  { %s1814_s21 = scalar_lea.hbm %s2312_s4, 4096 }
  0x39   :  { %p1815_p10 = scmp.ne.s32.totalorder %s2312_s4, %s1814_s21  ;;  %p1818_p11 = scmp.lt.u32.totalorder %s1814_s21, %s2312_s4 }
  0x3b   :  { %p1820_p12 = pnand %p1818_p11, %p1815_p10 }
  0x3d   :  { %1823 = shalt.err (!%p1820_p12)
}
  0x3e   :  { %s1824_s0 = scalar_lea.vmem %s55_s16, 4096  ;;  %p1829_p0 = scmp.lt.s32.totalorder %s55_s16, %s55_s16 }
  0x3f   :  { %p1825_p13 = scmp.ne.s32.totalorder %s55_s16, %s1824_s0  ;;  %p1830_p1 = scmp.lt.s32.totalorder %s1824_s0, %s1824_s0 }
  0x41   :  { %p1831_p2 = por %p1830_p1, %p1829_p0 }
  0x43   :  { %p1832_p3 = pnand %p1831_p2, %p1825_p13 }
  0x45   :  { %1835 = shalt.err (!%p1832_p3)
}
  0x46   :  { %60 = dma.hbm_to_vmem [thread:$0]  %s2312_s4, 4096, %s55_s16, [#allocation7], %s1917_s14, %s1917_s14, %s1918_s19  }
  0x47   :  { %s1836_s13 = scalar_lea.hbm %s2315_s7, 2048 }
  0x48   :  { %p1837_p4 = scmp.ne.s32.totalorder %s2315_s7, %s1836_s13  ;;  %p1840_p5 = scmp.lt.u32.totalorder %s1836_s13, %s2315_s7 }
  0x4a   :  { %p1842_p6 = pnand %p1840_p5, %p1837_p4 }
  0x4c   :  { %1845 = shalt.err (!%p1842_p6)
}
  0x4d   :  { %s1846_s1 = scalar_lea.vmem %s81_s18, 2048  ;;  %p1851_p8 = scmp.lt.s32.totalorder %s81_s18, %s81_s18 }
  0x4e   :  { %p1847_p7 = scmp.ne.s32.totalorder %s81_s18, %s1846_s1  ;;  %p1852_p9 = scmp.lt.s32.totalorder %s1846_s1, %s1846_s1 }
  0x50   :  { %p1853_p10 = por %p1852_p9, %p1851_p8 }
  0x52   :  { %p1854_p11 = pnand %p1853_p10, %p1847_p7 }
  0x54   :  { %1857 = shalt.err (!%p1854_p11)
}
  0x55   :  { %86 = dma.hbm_to_vmem [thread:$0]  %s2315_s7, 2048, %s81_s18, [#allocation10], %s1917_s14, %s1917_s14, %s1918_s19  }
  0x56   :  { %1902 = dma.done.wait [#allocation4], 1024  }
  0x57   :  { %1903 = vsyncadd [#allocation4], 4294966272 }
  0x58   :  { %1904 = dma.done.wait [#allocation7], 5120  }
  0x59   :  { %1905 = vsyncadd [#allocation7], 4294962176 }
  0x5a   :  { %1906 = dma.done.wait [#allocation10], 4096  }
  0x5b   :  { %1907 = vsyncadd [#allocation10], 4294963200  ;;  %v1921_v0 = vmov 0   ;;  %v1732_v1 = vld [vmem:[#allocation6] sm:$0xff]   ;;  %v1733_v2 = vld [vmem:[#allocation6 + $0x8] sm:$0xff]  }
  0x5c   :  { %1730 = vset.pattern.permute.xlu0 %v1921_v0  ;;  %1731 = vset.pattern.permute.xlu1 %v1921_v0  ;;  %v1734_v3 = vld [vmem:[#allocation6 + $0x10] sm:$0xff]   ;;  %v1735_v4 = vld [vmem:[#allocation6 + $0x18] sm:$0xff]   ;;  %v1740_v5 = vld [vmem:[#allocation3] sm:$0xff]  }
  0x5d   :  { %1462 = vmatprep.subr.bf16.mxu0 %v1732_v1  ;;  %1478 = vmatprep.mubr.bf16.mxu0 %v1740_v5  ;;  %v1736_v6 = vld [vmem:[#allocation6 + $0x20] sm:$0xff]   ;;  %v1737_v7 = vld [vmem:[#allocation6 + $0x28] sm:$0xff]   ;;  %v419_v9 = vld [vmem:[%s2311_s3 + $0x10] sm:$0xff] }
  0x5e   :  { %1463 = vmatpush3.bf16.msra.mxu0 %v1732_v1  ;;  %v417_v8 = vld [vmem:[%s2311_s3] sm:$0xff]  ;;  %445 = vperm.xlu1 %1731, %v419_v9   ;;  %v418_v10 = vld [vmem:[%s2311_s3 + $0x8] sm:$0xff]  ;;  %v420_v11 = vld [vmem:[%s2311_s3 + $0x18] sm:$0xff] }
  0x5f   :  { %1464 = vmatprep.subr.bf16.mxu0 %v1733_v2  ;;  %435 = vperm.xlu0 %1730, %v417_v8   ;;  %v1738_v12 = vld [vmem:[#allocation6 + $0x30] sm:$0xff]   ;;  %v421_v13 = vld [vmem:[%s2311_s3 + $0x20] sm:$0xff]  ;;  %v422_v14 = vld [vmem:[%s2311_s3 + $0x28] sm:$0xff] }
  0x60   :  { %v561_v15 = vld [vmem:[#allocation8 + $0x80] sm:$0xff]  ;;  %v562_v16 = vld [vmem:[#allocation8 + $0x88] sm:$0xff]  ;;  %v563_v20 = vld [vmem:[#allocation8 + $0x90] sm:$0xff] }
  0x61   :  { %v1606_v17 = vpack.c.bf16 %v562_v16, %v561_v15  ;;  %v545_v18 = vld [vmem:[#allocation8] sm:$0xff]  ;;  %v546_v19 = vld [vmem:[#allocation8 + $0x8] sm:$0xff]  ;;  %v564_v22 = vld [vmem:[#allocation8 + $0x98] sm:$0xff] }
  0x62   :  { %1465 = vmatpush3.bf16.msra.mxu0 %v1733_v2  ;;  %450 = vperm.xlu1 %1731, %v420_v11   ;;  %v1608_v21 = vpack.c.bf16 %v546_v19, %v545_v18  ;;  %v547_v23 = vld [vmem:[#allocation8 + $0x10] sm:$0xff]  ;;  %v548_v24 = vld [vmem:[#allocation8 + $0x18] sm:$0xff]  ;;  %v1610_v26 = vpack.c.bf16 %v564_v22, %v563_v20  ;;  %v565_v27 = vld [vmem:[#allocation8 + $0xa0] sm:$0xff] }
  0x63   :  { %1466 = vmatprep.subr.bf16.mxu0 %v1734_v3  ;;  %440 = vperm.xlu0 %1730, %v418_v10   ;;  %v1739_v25 = vld [vmem:[#allocation6 + $0x38] sm:$0xff]   ;;  %v566_v28 = vld [vmem:[#allocation8 + $0xa8] sm:$0xff]  ;;  %v423_v29 = vld [vmem:[%s2311_s3 + $0x30] sm:$0xff]  ;;  %v1612_v31 = vpack.c.bf16 %v548_v24, %v547_v23 }
  0x64   :  { %1607 = vmatprep.subr.bf16.mxu1 %v1606_v17  ;;  %v424_v30 = vld [vmem:[%s2311_s3 + $0x38] sm:$0xff]  ;;  %v1614_v32 = vpack.c.bf16 %v566_v28, %v565_v27  ;;  %v549_v33 = vld [vmem:[#allocation8 + $0x20] sm:$0xff]  ;;  %v550_v34 = vld [vmem:[#allocation8 + $0x28] sm:$0xff] }
  0x65   :  { %1609 = vmatpush3.bf16.msra.mxu1 %v1608_v21  ;;  %v567_v35 = vld [vmem:[#allocation8 + $0xb0] sm:$0xff]  ;;  %v568_v36 = vld [vmem:[#allocation8 + $0xb8] sm:$0xff]  ;;  %v1741_v37 = vld [vmem:[#allocation3 + $0x8] sm:$0xff]   ;;  %v1616_v40 = vpack.c.bf16 %v550_v34, %v549_v33 }
  0x66   :  { %1467 = vmatpush3.bf16.msra.mxu0 %v1734_v3  ;;  %460 = vperm.xlu1 %1731, %v422_v14   ;;  %v425_v38 = vld [vmem:[%s2311_s3 + $0x40] sm:$0xff]  ;;  %v426_v39 = vld [vmem:[%s2311_s3 + $0x48] sm:$0xff]  ;;  %v1742_v41 = vld [vmem:[#allocation3 + $0x10] sm:$0xff]   ;;  %v1618_v42 = vpack.c.bf16 %v568_v36, %v567_v35 }
  0x67   :  { %1468 = vmatprep.subr.bf16.mxu0 %v1735_v4  ;;  %455 = vperm.xlu0 %1730, %v421_v13   ;;  %v551_v43 = vld [vmem:[#allocation8 + $0x30] sm:$0xff]  ;;  %v552_v44 = vld [vmem:[#allocation8 + $0x38] sm:$0xff]  ;;  %v569_v45 = vld [vmem:[#allocation8 + $0xc0] sm:$0xff] }
  0x68   :  { %1611 = vmatprep.subr.bf16.mxu1 %v1610_v26  ;;  %v570_v46 = vld [vmem:[#allocation8 + $0xc8] sm:$0xff]  ;;  %v427_v47 = vld [vmem:[%s2311_s3 + $0x50] sm:$0xff]  ;;  %v428_v48 = vld [vmem:[%s2311_s3 + $0x58] sm:$0xff]  ;;  %v1620_v49 = vpack.c.bf16 %v552_v44, %v551_v43 }
  0x69   :  { %1613 = vmatpush3.bf16.msra.mxu1 %v1612_v31  ;;  %v1622_v50 = vpack.c.bf16 %v570_v46, %v569_v45  ;;  %v553_v51 = vld [vmem:[#allocation8 + $0x40] sm:$0xff]  ;;  %v554_v52 = vld [vmem:[#allocation8 + $0x48] sm:$0xff]  ;;  %v571_v53 = vld [vmem:[#allocation8 + $0xd0] sm:$0xff] }
  0x6a   :  { %1469 = vmatpush3.bf16.msra.mxu0 %v1735_v4  ;;  %470 = vperm.xlu1 %1731, %v424_v30   ;;  %v572_v54 = vld [vmem:[#allocation8 + $0xd8] sm:$0xff]  ;;  %v429_v56 = vld [vmem:[%s2311_s3 + $0x60] sm:$0xff]  ;;  %v430_v57 = vld [vmem:[%s2311_s3 + $0x68] sm:$0xff]  ;;  %v1624_v58 = vpack.c.bf16 %v554_v52, %v553_v51 }
  0x6b   :  { %1470 = vmatprep.subr.bf16.mxu0 %v1736_v6  ;;  %465 = vperm.xlu0 %1730, %v423_v29   ;;  %v1743_v55 = vld [vmem:[#allocation3 + $0x18] sm:$0xff]   ;;  %v1744_v59 = vld [vmem:[#allocation3 + $0x20] sm:$0xff]   ;;  %v1626_v60 = vpack.c.bf16 %v572_v54, %v571_v53  ;;  %v555_v61 = vld [vmem:[#allocation8 + $0x50] sm:$0xff] }
  0x6c   :  { %1615 = vmatprep.subr.bf16.mxu1 %v1614_v32  ;;  %v556_v62 = vld [vmem:[#allocation8 + $0x58] sm:$0xff]  ;;  %v573_v63 = vld [vmem:[#allocation8 + $0xe0] sm:$0xff]  ;;  %v574_v0 = vld [vmem:[#allocation8 + $0xe8] sm:$0xff] }
  0x6d   :  { %1617 = vmatpush3.bf16.msra.mxu1 %v1616_v40  ;;  %v431_v1 = vld [vmem:[%s2311_s3 + $0x70] sm:$0xff]  ;;  %v432_v2 = vld [vmem:[%s2311_s3 + $0x78] sm:$0xff]  ;;  %v1628_v3 = vpack.c.bf16 %v556_v62, %v555_v61  ;;  %v1630_v4 = vpack.c.bf16 %v574_v0, %v573_v63  ;;  %v557_v5 = vld [vmem:[#allocation8 + $0x60] sm:$0xff] }
  0x6e   :  { %1471 = vmatpush3.bf16.msra.mxu0 %v1736_v6  ;;  %480 = vperm.xlu1 %1731, %v426_v39   ;;  %v558_v6 = vld [vmem:[#allocation8 + $0x68] sm:$0xff]  ;;  %v1746_v9 = vld [vmem:[#allocation3 + $0x30] sm:$0xff]   ;;  %v1747_v10 = vld [vmem:[#allocation3 + $0x38] sm:$0xff]  }
  0x6f   :  { %1472 = vmatprep.subr.bf16.mxu0 %v1737_v7  ;;  %475 = vperm.xlu0 %1730, %v425_v38   ;;  %v1632_v8 = vpack.c.bf16 %v558_v6, %v557_v5  ;;  %v575_v11 = vld [vmem:[#allocation8 + $0xf0] sm:$0xff]  ;;  %v560_v15 = vld [vmem:[#allocation8 + $0x78] sm:$0xff]  ;;  %v529_v17 = vld [vmem:[%s2310_s2] sm:$0xff] }
  0x70   :  { %1619 = vmatprep.subr.bf16.mxu1 %v1618_v42  ;;  %v559_v14 = vld [vmem:[#allocation8 + $0x70] sm:$0xff]  ;;  %648 = vmatprep.mubr.f32.mxu1 %v529_v17  ;;  %v745_v18 = vld [vmem:[#allocation9] sm:$0xff]  ;;  %v746_v19 = vld [vmem:[#allocation9 + $0x8] sm:$0xff] }
  0x71   :  { %1621 = vmatpush3.bf16.msra.mxu1 %v1620_v49  ;;  %v1636_v16 = vpack.c.bf16 %v560_v15, %v559_v14  ;;  %v747_v20 = vld [vmem:[#allocation9 + $0x10] sm:$0xff]  ;;  %v1638_v21 = vpack.c.bf16 %v746_v19, %v745_v18  ;;  %v748_v22 = vld [vmem:[#allocation9 + $0x18] sm:$0xff]  ;;  %v749_v24 = vld [vmem:[#allocation9 + $0x20] sm:$0xff] }
  0x72   :  { %1473 = vmatpush3.bf16.msra.mxu0 %v1737_v7  ;;  %490 = vperm.xlu1 %1731, %v428_v48   ;;  %v1745_v7 = vld [vmem:[#allocation3 + $0x28] sm:$0xff]   ;;  %v1642_v23 = vpack.c.bf16 %v748_v22, %v747_v20  ;;  %v751_v27 = vld [vmem:[#allocation9 + $0x30] sm:$0xff]  ;;  %v752_v28 = vld [vmem:[#allocation9 + $0x38] sm:$0xff] }
  0x73   :  { %1474 = vmatprep.subr.bf16.mxu0 %v1738_v12  ;;  %485 = vperm.xlu0 %1730, %v427_v47   ;;  %v1650_v29 = vpack.c.bf16 %v752_v28, %v751_v27  ;;  %v753_v30 = vld [vmem:[#allocation9 + $0x40] sm:$0xff]  ;;  %v754_v31 = vld [vmem:[#allocation9 + $0x48] sm:$0xff]  ;;  %v531_v42 = vld [vmem:[%s2310_s2 + $0x10] sm:$0xff] }
  0x74   :  { %1623 = vmatprep.subr.bf16.mxu1 %v1622_v50  ;;  %v1654_v32 = vpack.c.bf16 %v754_v31, %v753_v30  ;;  %v530_v38 = vld [vmem:[%s2310_s2 + $0x8] sm:$0xff]  ;;  %v532_v48 = vld [vmem:[%s2310_s2 + $0x18] sm:$0xff]  ;;  %v533_v52 = vld [vmem:[%s2310_s2 + $0x20] sm:$0xff] }
  0x75   :  { %1625 = vmatpush3.bf16.msra.mxu1 %v1624_v58  ;;  %v534_v58 = vld [vmem:[%s2310_s2 + $0x28] sm:$0xff]  ;;  %v535_v62 = vld [vmem:[%s2310_s2 + $0x30] sm:$0xff]  ;;  %v540_v17 = vld [vmem:[%s2310_s2 + $0x58] sm:$0xff] }
  0x76   :  { %1475 = vmatpush3.bf16.msra.mxu0 %v1738_v12  ;;  %500 = vperm.xlu1 %1731, %v430_v57   ;;  %v576_v12 = vld [vmem:[#allocation8 + $0xf8] sm:$0xff]  ;;  %v539_v14 = vld [vmem:[%s2310_s2 + $0x50] sm:$0xff]  ;;  %v541_v20 = vld [vmem:[%s2310_s2 + $0x60] sm:$0xff] }
  0x77   :  { %1476 = vmatprep.subr.bf16.mxu0 %v1739_v25  ;;  %495 = vperm.xlu0 %1730, %v429_v56   ;;  %v1634_v13 = vpack.c.bf16 %v576_v12, %v575_v11  ;;  %v538_v11 = vld [vmem:[%s2310_s2 + $0x48] sm:$0xff] }
  0x78   :  { %1627 = vmatprep.subr.bf16.mxu1 %v1626_v60 }
  0x79   :  { %1629 = vmatpush3.bf16.msra.mxu1 %v1628_v3 }
  0x7a   :  { %1477 = vmatpush3.bf16.msra.mxu0 %v1739_v25  ;;  %510 = vperm.xlu1 %1731, %v432_v2   ;;  %v750_v25 = vld [vmem:[#allocation9 + $0x28] sm:$0xff] }
  0x7b   :  { %505 = vperm.xlu0 %1730, %v431_v1   ;;  %1631 = vmatprep.subr.bf16.mxu1 %v1630_v4  ;;  %v1646_v26 = vpack.c.bf16 %v750_v25, %v749_v24  ;;  %v536_v4 = vld [vmem:[%s2310_s2 + $0x38] sm:$0xff] }
  0x7c   :  { %1639 = vmatprep.subr.bf16.mxu0 %v1638_v21 }
  0x7d   :  { %1479 = vmatmul.mubr.bf16.vlgmr.msra.gmra.mrb[0].mxu0 %v1741_v37  ;;  %1633 = vmatpush3.bf16.msra.mxu1 %v1632_v8  ;;  %v537_v8 = vld [vmem:[%s2310_s2 + $0x40] sm:$0xff] }
  0x7e   :  { %1482 = vmatprep.mubr.bf16.mxu0 %v1742_v41  ;;  %1635 = vmatprep.subr.bf16.mxu1 %v1634_v13 }
  0x7f   :  { %1641 = vmatpush3.bf16.msra.mxu0 %v1638_v21 }
  0x80   :  { %1643 = vmatprep.subr.bf16.mxu0 %v1642_v23 }
  0x81   :  { %1637 = vmatpush3.bf16.msra.mxu1 %v1636_v16 }
  0x83   :  { %1645 = vmatpush3.bf16.msra.mxu0 %v1642_v23  ;;  %v542_v23 = vld [vmem:[%s2310_s2 + $0x68] sm:$0xff] }
  0x84   :  { %1647 = vmatprep.subr.bf16.mxu0 %v1646_v26 }
  0x85   :  { %1483 = vmatmul.mubr.bf16.gmra.mrb[4].mxu0 %v1743_v55 }
  0x86   :  { %1486 = vmatprep.mubr.bf16.mxu0 %v1744_v59 }
  0x87   :  { %1649 = vmatpush3.bf16.msra.mxu0 %v1646_v26  ;;  %v543_v26 = vld [vmem:[%s2310_s2 + $0x70] sm:$0xff] }
  0x88   :  { %1651 = vmatprep.subr.bf16.mxu0 %v1650_v29 }
  0x8b   :  { %1653 = vmatpush3.bf16.msra.mxu0 %v1650_v29  ;;  %v544_v29 = vld [vmem:[%s2310_s2 + $0x78] sm:$0xff] }
  0x8c   :  { %1655 = vmatprep.subr.bf16.mxu0 %v1654_v32 }
  0x8d   :  { %1487 = vmatmul.mubr.bf16.gmra.mrb[8].mxu0 %v1745_v7 }
  0x8e   :  { %1490 = vmatprep.mubr.bf16.mxu0 %v1746_v9 }
  0x8f   :  { %1657 = vmatpush3.bf16.msra.mxu0 %v1654_v32  ;;  %v755_v32 = vld [vmem:[#allocation9 + $0x50] sm:$0xff] }
  0x95   :  { %1491 = vmatmul.mubr.bf16.gmra.mrb[12].mxu0 %v1747_v10 }
  0xdd   :  { %v446_v43 = vpop.permute.xlu1 %445 }
  0xde   :  { %v436_v33 = vpop.permute.xlu0 %435 }
  0xe1   :  { %v451_v50 = vpop.permute.xlu1 %450 }
  0xe2   :  { %v441_v40 = vpop.permute.xlu0 %440 }
  0xe5   :  { %v461_v60 = vpop.permute.xlu1 %460 }
  0xe6   :  { %v456_v54 = vpop.permute.xlu0 %455 }
  0xe9   :  { %v471_v6 = vpop.permute.xlu1 %470 }
  0xea   :  { %v466_v0 = vpop.permute.xlu0 %465 }
  0xed   :  { %v481_v12 = vpop.permute.xlu1 %480 }
  0xee   :  { %v476_v9 = vpop.permute.xlu0 %475 }
  0xf1   :  { %v491_v18 = vpop.permute.xlu1 %490 }
  0xf2   :  { %v486_v15 = vpop.permute.xlu0 %485 }
  0xf5   :  { %v501_v24 = vpop.permute.xlu1 %500 }
  0xf6   :  { %v496_v21 = vpop.permute.xlu0 %495 }
  0xf9   :  { %v511_v30 = vpop.permute.xlu1 %510 }
  0xfa   :  { %v506_v27 = vpop.permute.xlu0 %505 }
 0x150   :  { %v1480_v34 = vpop.f32.mrb[0].mxu0 }
 0x151   :  { %v303_v35 = vpop.f32.mrb[1].mxu0  ;;  %v515_v46 = vmul.f32 %v1480_v34, %v446_v43 }
 0x152   :  { %v513_v36 = vmul.f32 %v436_v33, %v303_v35  ;;  %v1481_v37 = vpop.f32.mrb[2].mxu0  ;;  %v756_v33 = vld [vmem:[#allocation9 + $0x58] sm:$0xff]  ;;  %v757_v35 = vld [vmem:[#allocation9 + $0x60] sm:$0xff] }
 0x153   :  { %v306_v39 = vpop.f32.mrb[3].mxu0  ;;  %v516_v51 = vmul.f32 %v1481_v37, %v451_v50  ;;  %v1658_v34 = vpack.c.bf16 %v756_v33, %v755_v32  ;;  %v992_v50 = vld [vmem:[#allocation11 + $0x30] sm:$0xff] }
 0x154   :  { %649 = vmatmul.mubr.f32.vlgmr.msra.gmra.mrb[0].mxu1 %v513_v36  ;;  %v514_v41 = vmul.f32 %v441_v40, %v306_v39  ;;  %v758_v36 = vld [vmem:[#allocation9 + $0x68] sm:$0xff]  ;;  %v760_v39 = vld [vmem:[#allocation9 + $0x78] sm:$0xff] }
 0x155   :  { %653 = vmatprep.mubr.f32.mxu1 %v530_v38  ;;  %1659 = vmatprep.subr.bf16.mxu0 %v1658_v34  ;;  %v1662_v37 = vpack.c.bf16 %v758_v36, %v757_v35  ;;  %v759_v38 = vld [vmem:[#allocation9 + $0x70] sm:$0xff] }
 0x156   :  { %1661 = vmatpush3.bf16.msra.mxu0 %v1658_v34  ;;  %v1666_v40 = vpack.c.bf16 %v760_v39, %v759_v38 }
 0x157   :  { %1663 = vmatprep.subr.bf16.mxu0 %v1662_v37 }
 0x158   :  { %v1484_v44 = vpop.f32.mrb[4].mxu0  ;;  %654 = vmatmul.mubr.f32.gmra.mrb[2].mxu1 %v514_v41  ;;  %v986_v41 = vld [vmem:[#allocation11] sm:$0xff] }
 0x159   :  { %v319_v45 = vpop.f32.mrb[5].mxu0  ;;  %658 = vmatprep.mubr.f32.mxu1 %v531_v42  ;;  %v519_v2 = vmul.f32 %v1484_v44, %v466_v0  ;;  %v987_v42 = vld [vmem:[#allocation11 + $0x8] sm:$0xff]  ;;  %v988_v44 = vld [vmem:[#allocation11 + $0x10] sm:$0xff] }
 0x15a   :  { %v1485_v47 = vpop.f32.mrb[6].mxu0  ;;  %v517_v56 = vmul.f32 %v456_v54, %v319_v45  ;;  %1665 = vmatpush3.bf16.msra.mxu0 %v1662_v37  ;;  %v1670_v43 = vpack.c.bf16 %v987_v42, %v986_v41  ;;  %v989_v45 = vld [vmem:[#allocation11 + $0x18] sm:$0xff]  ;;  %v995_v54 = vld [vmem:[#allocation11 + $0x48] sm:$0xff] }
 0x15b   :  { %v322_v49 = vpop.f32.mrb[7].mxu0  ;;  %v520_v7 = vmul.f32 %v1485_v47, %v471_v6  ;;  %1667 = vmatprep.subr.bf16.mxu0 %v1666_v40  ;;  %v990_v47 = vld [vmem:[#allocation11 + $0x20] sm:$0xff] }
 0x15c   :  { %659 = vmatmul.mubr.f32.gmra.mrb[4].mxu1 %v515_v46  ;;  %v518_v61 = vmul.f32 %v461_v60, %v322_v49  ;;  %1702 = vmatprep.subr.bf16.mxu1 %v1670_v43  ;;  %v1674_v46 = vpack.c.bf16 %v989_v45, %v988_v44  ;;  %v999_v60 = vld [vmem:[#allocation11 + $0x68] sm:$0xff] }
 0x15d   :  { %663 = vmatprep.mubr.f32.mxu1 %v532_v48  ;;  %1710 = vmatpush3.bf16.msra.mxu1 %v1670_v43  ;;  %v991_v48 = vld [vmem:[#allocation11 + $0x28] sm:$0xff] }
 0x15e   :  { %1669 = vmatpush3.bf16.msra.mxu0 %v1666_v40  ;;  %1703 = vmatprep.subr.bf16.mxu1 %v1674_v46  ;;  %v1678_v49 = vpack.c.bf16 %v991_v48, %v990_v47 }
 0x15f   :  { %1671 = vmatprep.subr.bf16.mxu0 %v1670_v43 }
 0x160   :  { %v1488_v53 = vpop.f32.mrb[8].mxu0  ;;  %664 = vmatmul.mubr.f32.gmra.mrb[6].mxu1 %v516_v51  ;;  %v993_v51 = vld [vmem:[#allocation11 + $0x38] sm:$0xff] }
 0x161   :  { %v335_v55 = vpop.f32.mrb[9].mxu0  ;;  %668 = vmatprep.mubr.f32.mxu1 %v533_v52  ;;  %v523_v16 = vmul.f32 %v1488_v53, %v486_v15  ;;  %1711 = vmatpush3.bf16.msra.mxu1 %v1674_v46  ;;  %v2150_v52 = vpack.c.bf16 %v993_v51, %v992_v50  ;;  %v994_v53 = vld [vmem:[#allocation11 + $0x40] sm:$0xff] }
 0x162   :  { %v1489_v57 = vpop.f32.mrb[10].mxu0  ;;  %v521_v10 = vmul.f32 %v476_v9, %v335_v55  ;;  %1704 = vmatprep.subr.bf16.mxu1 %v1678_v49  ;;  %v2154_v55 = vpack.c.bf16 %v995_v54, %v994_v53 }
 0x163   :  { %v338_v59 = vpop.f32.mrb[11].mxu0  ;;  %v524_v19 = vmul.f32 %v1489_v57, %v491_v18  ;;  %v997_v57 = vld [vmem:[#allocation11 + $0x58] sm:$0xff] }
 0x164   :  { %669 = vmatmul.mubr.f32.gmra.mrb[8].mxu1 %v517_v56  ;;  %v522_v13 = vmul.f32 %v481_v12, %v338_v59  ;;  %v996_v56 = vld [vmem:[#allocation11 + $0x50] sm:$0xff]  ;;  %v998_v59 = vld [vmem:[#allocation11 + $0x60] sm:$0xff] }
 0x165   :  { %673 = vmatprep.mubr.f32.mxu1 %v534_v58  ;;  %1712 = vmatpush3.bf16.msra.mxu1 %v1678_v49  ;;  %v2158_v58 = vpack.c.bf16 %v997_v57, %v996_v56 }
 0x166   :  { %1705 = vmatprep.subr.bf16.mxu1 %v2150_v52 }
 0x168   :  { %v1492_v63 = vpop.f32.mrb[12].mxu0  ;;  %674 = vmatmul.mubr.f32.gmra.mrb[10].mxu1 %v518_v61  ;;  %v2162_v61 = vpack.c.bf16 %v999_v60, %v998_v59 }
 0x169   :  { %v351_v1 = vpop.f32.mrb[13].mxu0  ;;  %678 = vmatprep.mubr.f32.mxu1 %v535_v62  ;;  %v527_v28 = vmul.f32 %v1492_v63, %v506_v27  ;;  %1713 = vmatpush3.bf16.msra.mxu1 %v2150_v52  ;;  %v1000_v62 = vld [vmem:[#allocation11 + $0x70] sm:$0xff]  ;;  %v1001_v63 = vld [vmem:[#allocation11 + $0x78] sm:$0xff] }
 0x16a   :  { %v1493_v3 = vpop.f32.mrb[14].mxu0  ;;  %v525_v22 = vmul.f32 %v496_v21, %v351_v1  ;;  %1706 = vmatprep.subr.bf16.mxu1 %v2154_v55  ;;  %v2166_v0 = vpack.c.bf16 %v1001_v63, %v1000_v62 }
 0x16b   :  { %v354_v5 = vpop.f32.mrb[15].mxu0  ;;  %v528_v31 = vmul.f32 %v1493_v3, %v511_v30 }
 0x16c   :  { %679 = vmatmul.mubr.f32.gmra.mrb[12].mxu1 %v519_v2  ;;  %v526_v25 = vmul.f32 %v501_v24, %v354_v5  ;;  %v2173_v2 = vld [vmem:[%s2313_s5] ss:$0 sm:$0xff] }
 0x16d   :  { %683 = vmatprep.mubr.f32.mxu1 %v536_v4  ;;  %1714 = vmatpush3.bf16.msra.mxu1 %v2154_v55 }
 0x16e   :  { %1707 = vmatprep.subr.bf16.mxu1 %v2158_v58 }
 0x170   :  { %684 = vmatmul.mubr.f32.gmra.mrb[14].mxu1 %v520_v7 }
 0x171   :  { %688 = vmatprep.mubr.f32.mxu1 %v537_v8  ;;  %1715 = vmatpush3.bf16.msra.mxu1 %v2158_v58 }
 0x172   :  { %1708 = vmatprep.subr.bf16.mxu1 %v2162_v61 }
 0x174   :  { %689 = vmatmul.mubr.f32.gmra.mrb[16].mxu1 %v521_v10 }
 0x175   :  { %693 = vmatprep.mubr.f32.mxu1 %v538_v11  ;;  %1716 = vmatpush3.bf16.msra.mxu1 %v2162_v61 }
 0x176   :  { %1709 = vmatprep.subr.bf16.mxu1 %v2166_v0 }
 0x178   :  { %694 = vmatmul.mubr.f32.gmra.mrb[18].mxu1 %v522_v13 }
 0x179   :  { %698 = vmatprep.mubr.f32.mxu1 %v539_v14  ;;  %1717 = vmatpush3.bf16.msra.mxu1 %v2166_v0 }
 0x17c   :  { %699 = vmatmul.mubr.f32.gmra.mrb[20].mxu1 %v523_v16 }
 0x17d   :  { %703 = vmatprep.mubr.f32.mxu1 %v540_v17 }
 0x180   :  { %704 = vmatmul.mubr.f32.gmra.mrb[22].mxu1 %v524_v19 }
 0x181   :  { %708 = vmatprep.mubr.f32.mxu1 %v541_v20 }
 0x184   :  { %709 = vmatmul.mubr.f32.gmra.mrb[24].mxu1 %v525_v22 }
 0x185   :  { %713 = vmatprep.mubr.f32.mxu1 %v542_v23 }
 0x188   :  { %714 = vmatmul.mubr.f32.gmra.mrb[26].mxu1 %v526_v25 }
 0x189   :  { %718 = vmatprep.mubr.f32.mxu1 %v543_v26 }
 0x18c   :  { %719 = vmatmul.mubr.f32.gmra.mrb[28].mxu1 %v527_v28 }
 0x18d   :  { %723 = vmatprep.mubr.f32.mxu1 %v544_v29 }
 0x190   :  { %724 = vmatmul.mubr.f32.gmra.mrb[30].mxu1 %v528_v31 }
 0x227   :  { %v1350_v1 = vpop.f32.mrb[0].mxu1 }
 0x228   :  { %v1351_v3 = vpop.f32.mrb[1].mxu1 }
 0x229   :  { %v1352_v4 = vadd.f32 %v1351_v3, %v1350_v1 }
 0x22b   :  { %v2176_v5 = vadd.f32 %v1352_v4, %v2173_v2  ;;  %v1353_v6 = vpop.f32.mrb[2].mxu1 }
 0x22c   :  { %v1354_v7 = vpop.f32.mrb[3].mxu1 }
 0x22d   :  { %v729_v8 = vmax.f32 %v2176_v5, 0.0  ;;  %v1355_v9 = vadd.f32 %v1354_v7, %v1353_v6 }
 0x22f   :  { %v2180_v10 = vadd.f32 %v1355_v9, %v2173_v2  ;;  %v1356_v11 = vpop.f32.mrb[4].mxu1  ;;  %1526 = vmatprep.mubr.f32.mxu0 %v729_v8 }
 0x230   :  { %v1357_v12 = vpop.f32.mrb[5].mxu1 }
 0x231   :  { %v730_v13 = vmax.f32 %v2180_v10, 0.0  ;;  %v1358_v14 = vadd.f32 %v1357_v12, %v1356_v11 }
 0x233   :  { %v2186_v15 = vadd.f32 %v1358_v14, %v2173_v2  ;;  %v1359_v16 = vpop.f32.mrb[6].mxu1  ;;  %1527 = vmatmul.mubr.f32.vlgmr.msra.gmra.mrb[16].mxu0 %v730_v13 }
 0x234   :  { %v1360_v17 = vpop.f32.mrb[7].mxu1  ;;  %1673 = vmatpush3.bf16.msra.mxu0 %v1670_v43 }
 0x235   :  { %v731_v18 = vmax.f32 %v2186_v15, 0.0  ;;  %v1361_v19 = vadd.f32 %v1360_v17, %v1359_v16  ;;  %1675 = vmatprep.subr.bf16.mxu0 %v1674_v46 }
 0x237   :  { %v2192_v20 = vadd.f32 %v1361_v19, %v2173_v2  ;;  %v1362_v21 = vpop.f32.mrb[8].mxu1  ;;  %1529 = vmatprep.mubr.f32.mxu0 %v731_v18 }
 0x238   :  { %v1363_v22 = vpop.f32.mrb[9].mxu1  ;;  %1677 = vmatpush3.bf16.msra.mxu0 %v1674_v46 }
 0x239   :  { %v732_v23 = vmax.f32 %v2192_v20, 0.0  ;;  %v1364_v24 = vadd.f32 %v1363_v22, %v1362_v21  ;;  %1679 = vmatprep.subr.bf16.mxu0 %v1678_v49 }
 0x23b   :  { %v2198_v25 = vadd.f32 %v1364_v24, %v2173_v2  ;;  %v1365_v26 = vpop.f32.mrb[10].mxu1  ;;  %1530 = vmatmul.mubr.f32.gmra.mrb[18].mxu0 %v732_v23 }
 0x23c   :  { %v1366_v27 = vpop.f32.mrb[11].mxu1  ;;  %1681 = vmatpush3.bf16.msra.mxu0 %v1678_v49 }
 0x23d   :  { %v733_v28 = vmax.f32 %v2198_v25, 0.0  ;;  %v1367_v29 = vadd.f32 %v1366_v27, %v1365_v26  ;;  %1683 = vmatprep.subr.bf16.mxu0 %v2150_v52 }
 0x23f   :  { %v2205_v30 = vadd.f32 %v1367_v29, %v2173_v2  ;;  %v1368_v31 = vpop.f32.mrb[12].mxu1  ;;  %1532 = vmatprep.mubr.f32.mxu0 %v733_v28 }
 0x240   :  { %v1369_v32 = vpop.f32.mrb[13].mxu1  ;;  %1685 = vmatpush3.bf16.msra.mxu0 %v2150_v52 }
 0x241   :  { %v734_v33 = vmax.f32 %v2205_v30, 0.0  ;;  %v1370_v34 = vadd.f32 %v1369_v32, %v1368_v31  ;;  %1687 = vmatprep.subr.bf16.mxu0 %v2154_v55  ;;  %v2260_v30 = vld [vmem:[%s2316_s8] ss:$0 sm:$0xff]  ;;  %s1922_s8 = smov [#allocation12]  }
 0x242   :  { %s1175_s18 = sshll.u32 %s1922_s8, 4  ;;  %s1176_s18 = int_to_ptr.vmem [resolvable:$true] %s1175_s18 }
 0x243   :  { %v2213_v35 = vadd.f32 %v1370_v34, %v2173_v2  ;;  %v1371_v36 = vpop.f32.mrb[14].mxu1  ;;  %1533 = vmatmul.mubr.f32.gmra.mrb[20].mxu0 %v734_v33  ;;  %s1858_s20 = scalar_lea.vmem %s1176_s18, 1024  ;;  %p1863_p13 = scmp.lt.s32.totalorder %s1176_s18, %s1176_s18 }
 0x244   :  { %v1372_v37 = vpop.f32.mrb[15].mxu1  ;;  %1689 = vmatpush3.bf16.msra.mxu0 %v2154_v55  ;;  %p1859_p12 = scmp.ne.s32.totalorder %s1176_s18, %s1858_s20  ;;  %p1864_p0 = scmp.lt.s32.totalorder %s1858_s20, %s1858_s20 }
 0x245   :  { %v735_v38 = vmax.f32 %v2213_v35, 0.0  ;;  %v1373_v39 = vadd.f32 %v1372_v37, %v1371_v36  ;;  %1691 = vmatprep.subr.bf16.mxu0 %v2158_v58 }
 0x246   :  { %p1865_p1 = por %p1864_p0, %p1863_p13 }
 0x247   :  { %v2221_v40 = vadd.f32 %v1373_v39, %v2173_v2  ;;  %v1374_v41 = vpop.f32.mrb[16].mxu1  ;;  %1535 = vmatprep.mubr.f32.mxu0 %v735_v38 }
 0x248   :  { %v1375_v42 = vpop.f32.mrb[17].mxu1  ;;  %1693 = vmatpush3.bf16.msra.mxu0 %v2158_v58  ;;  %p1866_p2 = pnand %p1865_p1, %p1859_p12 }
 0x249   :  { %v736_v43 = vmax.f32 %v2221_v40, 0.0  ;;  %v1376_v44 = vadd.f32 %v1375_v42, %v1374_v41  ;;  %1695 = vmatprep.subr.bf16.mxu0 %v2162_v61 }
 0x24b   :  { %v691_v45 = vadd.f32 %v1376_v44, %v2173_v2  ;;  %v1377_v46 = vpop.f32.mrb[18].mxu1  ;;  %1536 = vmatmul.mubr.f32.gmra.mrb[22].mxu0 %v736_v43 }
 0x24c   :  { %v1378_v47 = vpop.f32.mrb[19].mxu1  ;;  %1697 = vmatpush3.bf16.msra.mxu0 %v2162_v61 }
 0x24d   :  { %v737_v48 = vmax.f32 %v691_v45, 0.0  ;;  %v1379_v49 = vadd.f32 %v1378_v47, %v1377_v46  ;;  %1699 = vmatprep.subr.bf16.mxu0 %v2166_v0 }
 0x24f   :  { %v696_v50 = vadd.f32 %v1379_v49, %v2173_v2  ;;  %v1380_v51 = vpop.f32.mrb[20].mxu1  ;;  %1538 = vmatprep.mubr.f32.mxu0 %v737_v48  ;;  %1594 = vmatprep.mubr.f32.mxu1 %v737_v48 }
 0x250   :  { %v1381_v52 = vpop.f32.mrb[21].mxu1  ;;  %1701 = vmatpush3.bf16.msra.mxu0 %v2166_v0 }
 0x251   :  { %v738_v53 = vmax.f32 %v696_v50, 0.0  ;;  %v1382_v54 = vadd.f32 %v1381_v52, %v1380_v51 }
 0x253   :  { %v701_v55 = vadd.f32 %v1382_v54, %v2173_v2  ;;  %v1383_v56 = vpop.f32.mrb[22].mxu1  ;;  %1539 = vmatmul.mubr.f32.gmra.mrb[24].mxu0 %v738_v53  ;;  %1595 = vmatmul.mubr.f32.vlgmr.msra.gmra.mrb[32].mxu1 %v738_v53 }
 0x254   :  { %v1384_v57 = vpop.f32.mrb[23].mxu1 }
 0x255   :  { %v739_v58 = vmax.f32 %v701_v55, 0.0  ;;  %v1385_v59 = vadd.f32 %v1384_v57, %v1383_v56 }
 0x257   :  { %v706_v60 = vadd.f32 %v1385_v59, %v2173_v2  ;;  %v1386_v61 = vpop.f32.mrb[24].mxu1  ;;  %1541 = vmatprep.mubr.f32.mxu0 %v739_v58  ;;  %1597 = vmatprep.mubr.f32.mxu1 %v739_v58 }
 0x258   :  { %v1387_v62 = vpop.f32.mrb[25].mxu1 }
 0x259   :  { %v740_v63 = vmax.f32 %v706_v60, 0.0  ;;  %v1388_v1 = vadd.f32 %v1387_v62, %v1386_v61 }
 0x25b   :  { %v711_v0 = vadd.f32 %v1388_v1, %v2173_v2  ;;  %v1389_v3 = vpop.f32.mrb[26].mxu1  ;;  %1542 = vmatmul.mubr.f32.gmra.mrb[26].mxu0 %v740_v63  ;;  %1598 = vmatmul.mubr.f32.gmra.mrb[34].mxu1 %v740_v63 }
 0x25c   :  { %v1390_v4 = vpop.f32.mrb[27].mxu1 }
 0x25d   :  { %v741_v6 = vmax.f32 %v711_v0, 0.0  ;;  %v1391_v7 = vadd.f32 %v1390_v4, %v1389_v3 }
 0x25f   :  { %v716_v9 = vadd.f32 %v1391_v7, %v2173_v2  ;;  %v1392_v11 = vpop.f32.mrb[28].mxu1  ;;  %1544 = vmatprep.mubr.f32.mxu0 %v741_v6  ;;  %1600 = vmatprep.mubr.f32.mxu1 %v741_v6 }
 0x260   :  { %v1393_v12 = vpop.f32.mrb[29].mxu1 }
 0x261   :  { %v742_v14 = vmax.f32 %v716_v9, 0.0  ;;  %v1394_v16 = vadd.f32 %v1393_v12, %v1392_v11 }
 0x263   :  { %v721_v17 = vadd.f32 %v1394_v16, %v2173_v2  ;;  %v1395_v19 = vpop.f32.mrb[30].mxu1  ;;  %1545 = vmatmul.mubr.f32.gmra.mrb[28].mxu0 %v742_v14  ;;  %1601 = vmatmul.mubr.f32.gmra.mrb[36].mxu1 %v742_v14 }
 0x264   :  { %v1396_v21 = vpop.f32.mrb[31].mxu1 }
 0x265   :  { %v743_v22 = vmax.f32 %v721_v17, 0.0  ;;  %v1397_v24 = vadd.f32 %v1396_v21, %v1395_v19 }
 0x267   :  { %v726_v26 = vadd.f32 %v1397_v24, %v2173_v2  ;;  %1547 = vmatprep.mubr.f32.mxu0 %v743_v22  ;;  %1603 = vmatprep.mubr.f32.mxu1 %v743_v22 }
 0x269   :  { %v744_v27 = vmax.f32 %v726_v26, 0.0 }
 0x26b   :  { %1548 = vmatmul.mubr.f32.gmra.mrb[30].mxu0 %v744_v27  ;;  %1604 = vmatmul.mubr.f32.gmra.mrb[38].mxu1 %v744_v27 }
 0x26c   :  { %1582 = vmatprep.mubr.f32.mxu0 %v729_v8 }
 0x26f   :  { %1583 = vmatmul.mubr.f32.vlgmr.msra.gmra.mrb[32].mxu0 %v730_v13 }
 0x270   :  { %1585 = vmatprep.mubr.f32.mxu0 %v731_v18 }
 0x273   :  { %1586 = vmatmul.mubr.f32.gmra.mrb[34].mxu0 %v732_v23 }
 0x274   :  { %1588 = vmatprep.mubr.f32.mxu0 %v733_v28 }
 0x277   :  { %1589 = vmatmul.mubr.f32.gmra.mrb[36].mxu0 %v734_v33 }
 0x278   :  { %1591 = vmatprep.mubr.f32.mxu0 %v735_v38 }
 0x27b   :  { %1592 = vmatmul.mubr.f32.gmra.mrb[38].mxu0 %v736_v43 }
 0x306   :  { %v1528_v2 = vpop.f32.mrb[16].mxu0 }
 0x307   :  { %v827_v5 = vpop.f32.mrb[17].mxu0 }
 0x308   :  { %v1258_v8 = vpack.c.bf16 %v1528_v2, %v827_v5 }
 0x30a   :  { %1259 = vst [vmem:[#allocation12] sm:$0xff] %v1258_v8  }
 0x30e   :  { %v1531_v10 = vpop.f32.mrb[18].mxu0 }
 0x30f   :  { %v837_v13 = vpop.f32.mrb[19].mxu0 }
 0x310   :  { %v1263_v15 = vpack.c.bf16 %v1531_v10, %v837_v13 }
 0x312   :  { %1295 = vst [vmem:[#allocation12 + $0x8] sm:$0xff] %v1263_v15  }
 0x316   :  { %v1534_v18 = vpop.f32.mrb[20].mxu0 }
 0x317   :  { %v847_v20 = vpop.f32.mrb[21].mxu0 }
 0x318   :  { %v1268_v23 = vpack.c.bf16 %v1534_v18, %v847_v20 }
 0x31a   :  { %1296 = vst [vmem:[#allocation12 + $0x10] sm:$0xff] %v1268_v23  }
 0x31e   :  { %v1537_v25 = vpop.f32.mrb[22].mxu0 }
 0x31f   :  { %v857_v28 = vpop.f32.mrb[23].mxu0 }
 0x320   :  { %v1273_v29 = vpack.c.bf16 %v1537_v25, %v857_v28 }
 0x322   :  { %1297 = vst [vmem:[#allocation12 + $0x18] sm:$0xff] %v1273_v29  }
 0x326   :  { %v1540_v31 = vpop.f32.mrb[24].mxu0  ;;  %v1596_v32 = vpop.f32.mrb[32].mxu1 }
 0x327   :  { %v1121_v33 = vadd.f32 %v1596_v32, %v2260_v30  ;;  %v867_v34 = vpop.f32.mrb[25].mxu0  ;;  %v1115_v35 = vpop.f32.mrb[33].mxu1 }
 0x328   :  { %v1278_v36 = vpack.c.bf16 %v1540_v31, %v867_v34  ;;  %v1116_v37 = vadd.f32 %v2260_v30, %v1115_v35 }
 0x329   :  { %1163 = vst [vmem:[#allocation13 + $0x48] sm:$0xff] %v1121_v33 }
 0x32a   :  { %1298 = vst [vmem:[#allocation12 + $0x20] sm:$0xff] %v1278_v36   ;;  %1162 = vst [vmem:[#allocation13 + $0x40] sm:$0xff] %v1116_v37 }
 0x32e   :  { %v1543_v38 = vpop.f32.mrb[26].mxu0  ;;  %v1599_v39 = vpop.f32.mrb[34].mxu1 }
 0x32f   :  { %v1131_v40 = vadd.f32 %v1599_v39, %v2260_v30  ;;  %v877_v41 = vpop.f32.mrb[27].mxu0  ;;  %v1125_v42 = vpop.f32.mrb[35].mxu1 }
 0x330   :  { %v1283_v43 = vpack.c.bf16 %v1543_v38, %v877_v41  ;;  %v1126_v44 = vadd.f32 %v2260_v30, %v1125_v42 }
 0x331   :  { %1165 = vst [vmem:[#allocation13 + $0x58] sm:$0xff] %v1131_v40 }
 0x332   :  { %1299 = vst [vmem:[#allocation12 + $0x28] sm:$0xff] %v1283_v43   ;;  %1164 = vst [vmem:[#allocation13 + $0x50] sm:$0xff] %v1126_v44 }
 0x336   :  { %v1546_v45 = vpop.f32.mrb[28].mxu0  ;;  %v1602_v46 = vpop.f32.mrb[36].mxu1 }
 0x337   :  { %v1141_v47 = vadd.f32 %v1602_v46, %v2260_v30  ;;  %v887_v48 = vpop.f32.mrb[29].mxu0  ;;  %v1135_v49 = vpop.f32.mrb[37].mxu1 }
 0x338   :  { %v1288_v50 = vpack.c.bf16 %v1546_v45, %v887_v48  ;;  %v1136_v51 = vadd.f32 %v2260_v30, %v1135_v49 }
 0x339   :  { %1167 = vst [vmem:[#allocation13 + $0x68] sm:$0xff] %v1141_v47 }
 0x33a   :  { %1300 = vst [vmem:[#allocation12 + $0x30] sm:$0xff] %v1288_v50   ;;  %1166 = vst [vmem:[#allocation13 + $0x60] sm:$0xff] %v1136_v51 }
 0x33e   :  { %v1549_v52 = vpop.f32.mrb[30].mxu0  ;;  %v1605_v53 = vpop.f32.mrb[38].mxu1 }
 0x33f   :  { %v1151_v54 = vadd.f32 %v1605_v53, %v2260_v30  ;;  %v897_v55 = vpop.f32.mrb[31].mxu0  ;;  %v1145_v56 = vpop.f32.mrb[39].mxu1 }
 0x340   :  { %v1293_v57 = vpack.c.bf16 %v1549_v52, %v897_v55  ;;  %v1146_v58 = vadd.f32 %v2260_v30, %v1145_v56 }
 0x341   :  { %1169 = vst [vmem:[#allocation13 + $0x78] sm:$0xff] %v1151_v54 }
 0x342   :  { %1301 = vst [vmem:[#allocation12 + $0x38] sm:$0xff] %v1293_v57   ;;  %1168 = vst [vmem:[#allocation13 + $0x70] sm:$0xff] %v1146_v58  ;;  %v1584_v59 = vpop.f32.mrb[32].mxu0 }
 0x343   :  { %v1081_v60 = vadd.f32 %v1584_v59, %v2260_v30  ;;  %v1075_v61 = vpop.f32.mrb[33].mxu0 }
 0x344   :  { %1869 = shalt.err (!%p1866_p2)
}
 0x345   :  { %s1870_s25 = scalar_lea.hbm %s2317_s9, 1024 }
 0x346   :  { %p1871_p3 = scmp.ne.s32.totalorder %s2317_s9, %s1870_s25  ;;  %p1874_p4 = scmp.lt.u32.totalorder %s1870_s25, %s2317_s9 }
 0x348   :  { %p1876_p5 = pnand %p1874_p4, %p1871_p3 }
 0x34a   :  { %1879 = shalt.err (!%p1876_p5)
}
 0x34b   :  { %1181 = dma.vmem_to_hbm [thread:$0]  %s1176_s18, 1024, %s2317_s9, [#allocation5], %s1913_s23, %s1913_s23, %s1914_s24   ;;  %v1076_v62 = vadd.f32 %v2260_v30, %v1075_v61  ;;  %1155 = vst [vmem:[#allocation13 + $0x8] sm:$0xff] %v1081_v60  ;;  %v1587_v63 = vpop.f32.mrb[34].mxu0 }
 0x34c   :  { %v1091_v1 = vadd.f32 %v1587_v63, %v2260_v30  ;;  %v1085_v0 = vpop.f32.mrb[35].mxu0  ;;  %s1923_s9 = smov [#allocation13]  }
 0x34d   :  { %1154 = vst [vmem:[#allocation13] sm:$0xff] %v1076_v62  ;;  %v1086_v3 = vadd.f32 %v2260_v30, %v1085_v0  ;;  %v1590_v4 = vpop.f32.mrb[36].mxu0  ;;  %s1187_s23 = sshll.u32 %s1923_s9, 4  ;;  %s1188_s23 = int_to_ptr.vmem [resolvable:$true] %s1187_s23 }
 0x34e   :  { %1157 = vst [vmem:[#allocation13 + $0x18] sm:$0xff] %v1091_v1  ;;  %v1101_v6 = vadd.f32 %v1590_v4, %v2260_v30  ;;  %v1095_v7 = vpop.f32.mrb[37].mxu0  ;;  %s1880_s24 = scalar_lea.vmem %s1188_s23, 2048  ;;  %p1885_p7 = scmp.lt.s32.totalorder %s1188_s23, %s1188_s23 }
 0x34f   :  { %1156 = vst [vmem:[#allocation13 + $0x10] sm:$0xff] %v1086_v3  ;;  %v1096_v9 = vadd.f32 %v2260_v30, %v1095_v7  ;;  %v1593_v11 = vpop.f32.mrb[38].mxu0  ;;  %p1881_p6 = scmp.ne.s32.totalorder %s1188_s23, %s1880_s24  ;;  %p1886_p8 = scmp.lt.s32.totalorder %s1880_s24, %s1880_s24 }
 0x350   :  { %1159 = vst [vmem:[#allocation13 + $0x28] sm:$0xff] %v1101_v6  ;;  %v1111_v12 = vadd.f32 %v1593_v11, %v2260_v30  ;;  %v1105_v14 = vpop.f32.mrb[39].mxu0 }
 0x351   :  { %1158 = vst [vmem:[#allocation13 + $0x20] sm:$0xff] %v1096_v9  ;;  %v1106_v16 = vadd.f32 %v2260_v30, %v1105_v14  ;;  %p1887_p9 = por %p1886_p8, %p1885_p7 }
 0x352   :  { %1161 = vst [vmem:[#allocation13 + $0x38] sm:$0xff] %v1111_v12 }
 0x353   :  { %1160 = vst [vmem:[#allocation13 + $0x30] sm:$0xff] %v1106_v16  ;;  %p1888_p10 = pnand %p1887_p9, %p1881_p6 }
 0x355   :  { %1891 = shalt.err (!%p1888_p10)
}
 0x356   :  { %s1892_s13 = scalar_lea.hbm %s2318_s10, 2048 }
 0x357   :  { %p1893_p11 = scmp.ne.s32.totalorder %s2318_s10, %s1892_s13  ;;  %p1896_p12 = scmp.lt.u32.totalorder %s1892_s13, %s2318_s10 }
 0x359   :  { %p1898_p13 = pnand %p1896_p12, %p1893_p11 }
 0x35b   :  { %1901 = shalt.err (!%p1898_p13)
}
 0x35c   :  { %1193 = dma.vmem_to_hbm [thread:$0]  %s1188_s23, 2048, %s2318_s10, [#allocation14], %s1917_s14, %s1917_s14, %s1918_s19  }
 0x35d   :  { %1908 = dma.done.wait [#allocation5], 1024  }
 0x35e   :  { %1909 = vsyncadd [#allocation5], 4294966272 }
 0x35f   :  { %1910 = dma.done.wait [#allocation14], 2048  }
 0x360   :  { %1911 = vsyncadd [#allocation14], 4294965248 }
 0x361   :  { %1200 = vsyncpa [#allocation4], 1 }
 0x362   :  { %1201 = vsyncpa [#allocation7], 1 }
 0x363   :  { %1202 = vsyncpa [#allocation10], 1 }
 0x364   :  { %1203 = vsyncpa [#allocation5], 1 }
 0x365   :  { %1204 = vsyncpa [#allocation14], 1 }

</bundles_post_ra>
